<compile_context>
chip_gen: v5e
topology: v5e:2x2
jax: 0.10.0
libtpu: 0.0.40
codegen_flags: <defaults>
</compile_context>

<pallas_src>
import functools

import jax
import jax.numpy as jnp
import numpy as np
from jax.experimental import pallas as pl
from jax.experimental.pallas import tpu as pltpu


# -----------------------------------------------------------------------------
# per-generation tile / VMEM budgets
# -----------------------------------------------------------------------------
def _tile_budget():
    """Pick tile-size targets and VMEM limits per TPU generation (HBM-bound pass)."""
    kind = ""
    try:
        kind = jax.devices()[0].device_kind.lower()
    except Exception:
        pass
    vmem_cap = None
    try:
        vmem_cap = pltpu.get_tpu_info().vmem_capacity_bytes
    except Exception:
        pass

    is_v5e = ("v5 lite" in kind) or ("v5e" in kind) or ("v5litepod" in kind)
    small_vmem = vmem_cap is not None and vmem_cap <= 80 * (1 << 20)  # v7x: 64 MiB/TC

    if is_v5e:
        # ~820 GB/s HBM: 0.5-1 MiB tiles already saturate; keep VMEM modest.
        return dict(target_tile=1 << 20, vmem_limit=32 << 20, gamma_resident_cap=1 << 20)
    if small_vmem:
        # v7x: ~3.2 TB/s HBM but only 64 MiB VMEM -> big tiles, bounded budget.
        return dict(target_tile=6 << 20, vmem_limit=40 << 20, gamma_resident_cap=2 << 20)
    # v6e (and default): 128 MiB VMEM, ~1.4 TB/s HBM.
    return dict(target_tile=4 << 20, vmem_limit=64 << 20, gamma_resident_cap=2 << 20)


def _largest_divisor_multiple(dim, quantum, cap):
    """Largest d with d % quantum == 0, d | dim, d <= min(cap, dim); None if none."""
    best = None
    cap = min(cap, dim)
    d = quantum
    while d <= cap:
        if dim % d == 0:
            best = d
        d += quantum
    return best


def _modulate_tiles(R, HW, itemsize, target_bytes):
    """Choose (row_t, hw_t) for the (R=B*C, HW) modulation pass.

    Lane axis stays 128-dense whenever HW allows; remaining budget is filled by
    folding batch*channel rows into the sublane axis (key at small resolutions)."""
    if HW % 128 == 0:
        lane_cap = max(128, target_bytes // (8 * itemsize))
        hw_t = _largest_divisor_multiple(HW, 128, lane_cap) or HW
    else:
        hw_t = HW  # full-dim lane block (legal; masked stores only for odd spatial sizes)

    row_cap = max(8, target_bytes // (hw_t * itemsize))
    if R % 8 == 0:
        row_t = _largest_divisor_multiple(R, 8, row_cap) or 8
    else:
        row_t = R  # full-dim block for odd (tiny) configs

    # Keep >= 2 row tiles when possible so megacore (v7x) always has parallel work.
    if row_t == R and R >= 16 and R % 16 == 0:
        row_t = R // 2
    return row_t, hw_t


# -----------------------------------------------------------------------------
# Pallas kernels
# -----------------------------------------------------------------------------
def _fused_mlp_kernel(y_ref, w1_ref, b1_ref, w2g_ref, b2g_ref, w2b_ref, b2b_ref,
                      gamma_ref, beta_ref, *, num_features):
    """gamma, beta = (ReLU(y @ [W1_g|W1_b] + b1)) split -> two dense Linear2's."""
    h = jnp.dot(y_ref[...], w1_ref[...], preferred_element_type=jnp.float32)
    h = jnp.maximum(h + b1_ref[...], 0.0)
    hg = h[:, :num_features]
    hb = h[:, num_features:]
    gamma = jnp.dot(hg, w2g_ref[...], preferred_element_type=jnp.float32) + b2g_ref[...]
    beta = jnp.dot(hb, w2b_ref[...], preferred_element_type=jnp.float32) + b2b_ref[...]
    gamma_ref[...] = gamma.astype(gamma_ref.dtype)
    beta_ref[...] = beta.astype(beta_ref.dtype)


def _make_modulate_kernel(row_t, resident):
    """out = gamma * x + beta on a (row_t, hw_t) tile of the (B*C, HW) view.

    resident=True: gamma/beta refs hold the whole (R, 1) arrays (fetched once);
    slice the per-tile rows in-kernel. resident=False: refs already hold the
    (row_t, 1) block for this tile."""
    def kernel(x_ref, g_ref, b_ref, o_ref):
        if resident:
            r0 = pl.program_id(0) * row_t
            if row_t % 8 == 0:
                r0 = pl.multiple_of(r0, 8)
            g = g_ref[pl.ds(r0, row_t), :]
            b = b_ref[pl.ds(r0, row_t), :]
        else:
            g = g_ref[...]
            b = b_ref[...]
        o_ref[...] = (g * x_ref[...] + b).astype(o_ref.dtype)

    return kernel


# -----------------------------------------------------------------------------
# kernel wrappers
# -----------------------------------------------------------------------------
def fused_affine_mlp(y, p):
    """y: (B, cond_dim) -> gamma, beta each (B, C), one launch, one grid step."""
    B, cond_dim = y.shape
    C = p["w2_g"].shape[0]
    two_c = 2 * C
    itemsize = jnp.dtype(y.dtype).itemsize
    flops = 2 * B * cond_dim * two_c + 2 * (2 * B * C * C)
    bytes_accessed = (B * cond_dim + cond_dim * two_c + two_c
                      + 2 * (C * C + C) + 2 * B * C) * itemsize

    kernel = functools.partial(_fused_mlp_kernel, num_features=C)
    gamma, beta = pl.pallas_call(
        kernel,
        out_shape=(jax.ShapeDtypeStruct((B, C), y.dtype),
                   jax.ShapeDtypeStruct((B, C), y.dtype)),
        grid_spec=pltpu.PrefetchScalarGridSpec(
            num_scalar_prefetch=0,
            grid=(1,),
            in_specs=[
                pl.BlockSpec((B, cond_dim), lambda i: (0, 0)),
                pl.BlockSpec(p["w1"].shape, lambda i: (0, 0)),
                pl.BlockSpec(p["b1"].shape, lambda i: (0, 0)),
                pl.BlockSpec(p["w2_g"].shape, lambda i: (0, 0)),
                pl.BlockSpec(p["b2_g"].shape, lambda i: (0, 0)),
                pl.BlockSpec(p["w2_b"].shape, lambda i: (0, 0)),
                pl.BlockSpec(p["b2_b"].shape, lambda i: (0, 0)),
            ],
            out_specs=(pl.BlockSpec((B, C), lambda i: (0, 0)),
                       pl.BlockSpec((B, C), lambda i: (0, 0))),
        ),
        compiler_params=pltpu.CompilerParams(
            dimension_semantics=("arbitrary",),
            vmem_limit_bytes=32 * 1024 * 1024,
        ),
        cost_estimate=pl.CostEstimate(flops=flops, transcendentals=0,
                                      bytes_accessed=bytes_accessed),
    )(y, p["w1"], p["b1"], p["w2_g"], p["b2_g"], p["w2_b"], p["b2_b"])
    return gamma, beta


def modulate(x2, gamma2, beta2):
    """x2: (R=B*C, HW) NCHW view; gamma2/beta2: (R, 1). Tiled gamma*x + beta."""
    R, HW = x2.shape
    itemsize = jnp.dtype(x2.dtype).itemsize
    budget = _tile_budget()
    row_t, hw_t = _modulate_tiles(R, HW, itemsize, budget["target_tile"])
    grid = (R // row_t, HW // hw_t)

    resident = (grid[0] > 1
                and R % 8 == 0 and row_t % 8 == 0
                and 2 * R * 128 * itemsize <= budget["gamma_resident_cap"])

    if resident:
        g_spec = pl.BlockSpec((R, 1), lambda i, j: (0, 0))   # fetched once, reused
        b_spec = pl.BlockSpec((R, 1), lambda i, j: (0, 0))
    else:
        g_spec = pl.BlockSpec((row_t, 1), lambda i, j: (i, 0))
        b_spec = pl.BlockSpec((row_t, 1), lambda i, j: (i, 0))

    return pl.pallas_call(
        _make_modulate_kernel(row_t, resident),
        out_shape=jax.ShapeDtypeStruct((R, HW), x2.dtype),
        grid_spec=pltpu.PrefetchScalarGridSpec(
            num_scalar_prefetch=0,
            grid=grid,
            in_specs=[
                pl.BlockSpec((row_t, hw_t), lambda i, j: (i, j)),
                g_spec,
                b_spec,
            ],
            out_specs=pl.BlockSpec((row_t, hw_t), lambda i, j: (i, j)),
        ),
        compiler_params=pltpu.CompilerParams(
            dimension_semantics=("parallel", "parallel"),
            vmem_limit_bytes=budget["vmem_limit"],
        ),
        cost_estimate=pl.CostEstimate(
            flops=2 * R * HW,
            transcendentals=0,
            bytes_accessed=(2 * R * HW + 2 * R) * itemsize,
        ),
    )(x2, gamma2, beta2)


def affine_forward(params, x, y):
    """Pallas Affine.forward.  x: (B, C, H, W) NCHW, y: (B, cond_dim)."""
    B, C, H, W = x.shape
    gamma, beta = fused_affine_mlp(y, params)              # (B, C) each, lane-dense
    out = modulate(x.reshape(B * C, H * W),                # metadata-only reshapes
                   gamma.reshape(B * C, 1),
                   beta.reshape(B * C, 1))
    return out.reshape(B, C, H, W)


# -----------------------------------------------------------------------------
# parameters
# -----------------------------------------------------------------------------
def init_affine_params(key, cond_dim, num_features):
    """nn.Linear-style deterministic random init.
    NOTE: Affine._initialize() in the PyTorch reference zeroes linear2 weights
    (gamma bias = 1, beta bias = 0), which makes the forward an identity; random
    values are used here so every code path does real, checkable compute (the
    forward formula is unchanged)."""
    ks = jax.random.split(key, 8)

    def linear(kw, kb, fan_in, fan_out):
        bound = 1.0 / np.sqrt(fan_in)
        w = jax.random.uniform(kw, (fan_in, fan_out), jnp.float32, -bound, bound)
        b = jax.random.uniform(kb, (1, fan_out), jnp.float32, -bound, bound)
        return w, b

    w1g, b1g = linear(ks[0], ks[1], cond_dim, num_features)
    w2g, b2g = linear(ks[2], ks[3], num_features, num_features)
    w1b, b1b = linear(ks[4], ks[5], cond_dim, num_features)
    w2b, b2b = linear(ks[6], ks[7], num_features, num_features)
    return dict(gamma=dict(w1=w1g, b1=b1g, w2=w2g, b2=b2g),
                beta=dict(w1=w1b, b1=b1b, w2=w2b, b2=b2b))


def fuse_affine_params(raw):
    """Fuse fc_gamma / fc_beta layer-1 ([W1_g | W1_b], [b1_g | b1_b]); layer-2
    weights stay separate dense matrices (no half-zero block diagonal)."""
    g, b = raw["gamma"], raw["beta"]
    return dict(
        w1=jnp.concatenate([g["w1"], b["w1"]], axis=1),
        b1=jnp.concatenate([g["b1"], b["b1"]], axis=1),
        w2_g=g["w2"], b2_g=g["b2"],
        w2_b=b["w2"], b2_b=b["b2"],
    )


def affine_reference(raw, x, y):
    """Pure-JAX reference (mirrors the PyTorch forward)."""
    def mlp(p):
        h = jnp.maximum(
            jnp.dot(y, p["w1"], precision=jax.lax.Precision.HIGHEST) + p["b1"], 0.0)
        return jnp.dot(h, p["w2"], precision=jax.lax.Precision.HIGHEST) + p["b2"]

    gamma = mlp(raw["gamma"])
    beta = mlp(raw["beta"])
    return gamma[:, :, None, None] * x + beta[:, :, None, None]


# -----------------------------------------------------------------------------
if __name__ == "__main__":
    # Small but lane-dense config: C=128 channels, 16x16 spatial (H*W=256 lanes).
    B, COND_DIM, NUM_FEATURES, H, W = 2, 16, 128, 16, 16

    key = jax.random.PRNGKey(0)
    kp, kx, ky = jax.random.split(key, 3)
    raw = init_affine_params(kp, COND_DIM, NUM_FEATURES)
    fused = fuse_affine_params(raw)

    x = jax.random.normal(kx, (B, NUM_FEATURES, H, W), dtype=jnp.float32)
    y = jax.random.normal(ky, (B, COND_DIM), dtype=jnp.float32)

    fwd = jax.jit(affine_forward)
    out = jax.block_until_ready(fwd(fused, x, y))

    assert out.shape == (B, NUM_FEATURES, H, W), out.shape
    ref = affine_reference(raw, x, y)
    np.testing.assert_allclose(np.asarray(out), np.asarray(ref), rtol=5e-3, atol=5e-3)
    print("KERNEL_OK")
</pallas_src>

<mosaic_0001>
module attributes {stable_mosaic.version = 11 : i64} {
  func.func @_fused_mlp_kernel(%arg0: i32, %arg1: memref<2x16xf32, #tpu.memory_space<vmem>>, %arg2: memref<16x256xf32, #tpu.memory_space<vmem>>, %arg3: memref<1x256xf32, #tpu.memory_space<vmem>>, %arg4: memref<128x128xf32, #tpu.memory_space<vmem>>, %arg5: memref<1x128xf32, #tpu.memory_space<vmem>>, %arg6: memref<128x128xf32, #tpu.memory_space<vmem>>, %arg7: memref<1x128xf32, #tpu.memory_space<vmem>>, %arg8: memref<2x128xf32, #tpu.memory_space<vmem>>, %arg9: memref<2x128xf32, #tpu.memory_space<vmem>>) attributes {dimension_semantics = [#tpu.dimension_semantics<arbitrary>], iteration_bounds = array<i64: 1>, scalar_prefetch = 0 : i64, scratch_operands = 0 : i64, tpu.core_type = #tpu.core_type<tc>, window_params = [{pipeline_mode = #tpu.pipeline_mode<synchronous>, transform_indices = @transform_0, window_bounds = array<i64: 2, 16>}, {pipeline_mode = #tpu.pipeline_mode<synchronous>, transform_indices = @transform_1, window_bounds = array<i64: 16, 256>}, {pipeline_mode = #tpu.pipeline_mode<synchronous>, transform_indices = @transform_2, window_bounds = array<i64: 1, 256>}, {pipeline_mode = #tpu.pipeline_mode<synchronous>, transform_indices = @transform_3, window_bounds = array<i64: 128, 128>}, {pipeline_mode = #tpu.pipeline_mode<synchronous>, transform_indices = @transform_4, window_bounds = array<i64: 1, 128>}, {pipeline_mode = #tpu.pipeline_mode<synchronous>, transform_indices = @transform_5, window_bounds = array<i64: 128, 128>}, {pipeline_mode = #tpu.pipeline_mode<synchronous>, transform_indices = @transform_6, window_bounds = array<i64: 1, 128>}, {pipeline_mode = #tpu.pipeline_mode<synchronous>, transform_indices = @transform_7, window_bounds = array<i64: 2, 128>}, {pipeline_mode = #tpu.pipeline_mode<synchronous>, transform_indices = @transform_8, window_bounds = array<i64: 2, 128>}]} {
    %c0 = arith.constant 0 : index
    %c0_0 = arith.constant 0 : index
    %0 = vector.load %arg1[%c0, %c0_0] : memref<2x16xf32, #tpu.memory_space<vmem>>, vector<2x16xf32>
    %c0_1 = arith.constant 0 : index
    %c0_2 = arith.constant 0 : index
    %1 = vector.load %arg2[%c0_1, %c0_2] : memref<16x256xf32, #tpu.memory_space<vmem>>, vector<16x256xf32>
    %cst = arith.constant dense<0.000000e+00> : vector<2x256xf32>
    %2 = tpu.matmul %0, %1, %cst {dimension_numbers = #tpu.dot_dimension_numbers<[1], [0], [0], [1], [0, 0, 1, 1], [], []>} : vector<2x16xf32>, vector<16x256xf32>, vector<2x256xf32> -> vector<2x256xf32>
    %c0_3 = arith.constant 0 : index
    %c0_4 = arith.constant 0 : index
    %3 = vector.load %arg3[%c0_3, %c0_4] : memref<1x256xf32, #tpu.memory_space<vmem>>, vector<1x256xf32>
    %4 = vector.broadcast %3 : vector<1x256xf32> to vector<2x256xf32>
    %5 = arith.addf %2, %4 : vector<2x256xf32>
    %cst_5 = arith.constant 0.000000e+00 : f32
    %6 = vector.broadcast %cst_5 : f32 to vector<2x256xf32>
    %7 = arith.maximumf %5, %6 : vector<2x256xf32>
    %8 = vector.extract_strided_slice %7 {offsets = [0, 0], sizes = [2, 128], strides = [1, 1]} : vector<2x256xf32> to vector<2x128xf32>
    %9 = vector.extract_strided_slice %7 {offsets = [0, 128], sizes = [2, 128], strides = [1, 1]} : vector<2x256xf32> to vector<2x128xf32>
    %c0_6 = arith.constant 0 : index
    %c0_7 = arith.constant 0 : index
    %10 = vector.load %arg4[%c0_6, %c0_7] : memref<128x128xf32, #tpu.memory_space<vmem>>, vector<128x128xf32>
    %cst_8 = arith.constant dense<0.000000e+00> : vector<2x128xf32>
    %11 = tpu.matmul %8, %10, %cst_8 {dimension_numbers = #tpu.dot_dimension_numbers<[1], [0], [0], [1], [0, 0, 1, 1], [], []>} : vector<2x128xf32>, vector<128x128xf32>, vector<2x128xf32> -> vector<2x128xf32>
    %c0_9 = arith.constant 0 : index
    %c0_10 = arith.constant 0 : index
    %12 = vector.load %arg5[%c0_9, %c0_10] : memref<1x128xf32, #tpu.memory_space<vmem>>, vector<1x128xf32>
    %13 = vector.broadcast %12 : vector<1x128xf32> to vector<2x128xf32>
    %14 = arith.addf %11, %13 : vector<2x128xf32>
    %c0_11 = arith.constant 0 : index
    %c0_12 = arith.constant 0 : index
    %15 = vector.load %arg6[%c0_11, %c0_12] : memref<128x128xf32, #tpu.memory_space<vmem>>, vector<128x128xf32>
    %cst_13 = arith.constant dense<0.000000e+00> : vector<2x128xf32>
    %16 = tpu.matmul %9, %15, %cst_13 {dimension_numbers = #tpu.dot_dimension_numbers<[1], [0], [0], [1], [0, 0, 1, 1], [], []>} : vector<2x128xf32>, vector<128x128xf32>, vector<2x128xf32> -> vector<2x128xf32>
    %c0_14 = arith.constant 0 : index
    %c0_15 = arith.constant 0 : index
    %17 = vector.load %arg7[%c0_14, %c0_15] : memref<1x128xf32, #tpu.memory_space<vmem>>, vector<1x128xf32>
    %18 = vector.broadcast %17 : vector<1x128xf32> to vector<2x128xf32>
    %19 = arith.addf %16, %18 : vector<2x128xf32>
    %c0_16 = arith.constant 0 : index
    %c0_17 = arith.constant 0 : index
    %20 = vector.load %arg8[%c0_16, %c0_17] : memref<2x128xf32, #tpu.memory_space<vmem>>, vector<2x128xf32>
    tpu.vector_store %arg8[%c0_16, %c0_17], %14 {strides = array<i32>} : memref<2x128xf32, #tpu.memory_space<vmem>>, vector<2x128xf32>,
    %c0_18 = arith.constant 0 : index
    %c0_19 = arith.constant 0 : index
    %21 = vector.load %arg9[%c0_18, %c0_19] : memref<2x128xf32, #tpu.memory_space<vmem>>, vector<2x128xf32>
    tpu.vector_store %arg9[%c0_18, %c0_19], %19 {strides = array<i32>} : memref<2x128xf32, #tpu.memory_space<vmem>>, vector<2x128xf32>,
    return
  }
  func.func @transform_0(%arg0: i32) -> (i32, i32) {
    %c0_i32 = arith.constant 0 : i32
    %c0_i32_0 = arith.constant 0 : i32
    %c0_i32_1 = arith.constant 0 : i32
    return %c0_i32, %c0_i32_0 : i32, i32
  }
  func.func @transform_1(%arg0: i32) -> (i32, i32) {
    %c0_i32 = arith.constant 0 : i32
    %c0_i32_0 = arith.constant 0 : i32
    %c0_i32_1 = arith.constant 0 : i32
    return %c0_i32, %c0_i32_0 : i32, i32
  }
  func.func @transform_2(%arg0: i32) -> (i32, i32) {
    %c0_i32 = arith.constant 0 : i32
    %c0_i32_0 = arith.constant 0 : i32
    %c0_i32_1 = arith.constant 0 : i32
    return %c0_i32, %c0_i32_0 : i32, i32
  }
  func.func @transform_3(%arg0: i32) -> (i32, i32) {
    %c0_i32 = arith.constant 0 : i32
    %c0_i32_0 = arith.constant 0 : i32
    %c0_i32_1 = arith.constant 0 : i32
    return %c0_i32, %c0_i32_0 : i32, i32
  }
  func.func @transform_4(%arg0: i32) -> (i32, i32) {
    %c0_i32 = arith.constant 0 : i32
    %c0_i32_0 = arith.constant 0 : i32
    %c0_i32_1 = arith.constant 0 : i32
    return %c0_i32, %c0_i32_0 : i32, i32
  }
  func.func @transform_5(%arg0: i32) -> (i32, i32) {
    %c0_i32 = arith.constant 0 : i32
    %c0_i32_0 = arith.constant 0 : i32
    %c0_i32_1 = arith.constant 0 : i32
    return %c0_i32, %c0_i32_0 : i32, i32
  }
  func.func @transform_6(%arg0: i32) -> (i32, i32) {
    %c0_i32 = arith.constant 0 : i32
    %c0_i32_0 = arith.constant 0 : i32
    %c0_i32_1 = arith.constant 0 : i32
    return %c0_i32, %c0_i32_0 : i32, i32
  }
  func.func @transform_7(%arg0: i32) -> (i32, i32) {
    %c0_i32 = arith.constant 0 : i32
    %c0_i32_0 = arith.constant 0 : i32
    %c0_i32_1 = arith.constant 0 : i32
    return %c0_i32, %c0_i32_0 : i32, i32
  }
  func.func @transform_8(%arg0: i32) -> (i32, i32) {
    %c0_i32 = arith.constant 0 : i32
    %c0_i32_0 = arith.constant 0 : i32
    %c0_i32_1 = arith.constant 0 : i32
    return %c0_i32, %c0_i32_0 : i32, i32
  }
}

module attributes {stable_mosaic.version = 11 : i64} {
  func.func @kernel(%arg0: i32, %arg1: i32, %arg2: memref<128x256xf32, #tpu.memory_space<vmem>>, %arg3: memref<256x1xf32, #tpu.memory_space<vmem>>, %arg4: memref<256x1xf32, #tpu.memory_space<vmem>>, %arg5: memref<128x256xf32, #tpu.memory_space<vmem>>) attributes {dimension_semantics = [#tpu.dimension_semantics<parallel>, #tpu.dimension_semantics<parallel>], iteration_bounds = array<i64: 2, 1>, scalar_prefetch = 0 : i64, scratch_operands = 0 : i64, tpu.core_type = #tpu.core_type<tc>, window_params = [{transform_indices = @transform_0, window_bounds = array<i64: 128, 256>}, {pipeline_mode = #tpu.pipeline_mode<synchronous>, transform_indices = @transform_1, window_bounds = array<i64: 256, 1>}, {pipeline_mode = #tpu.pipeline_mode<synchronous>, transform_indices = @transform_2, window_bounds = array<i64: 256, 1>}, {transform_indices = @transform_3, window_bounds = array<i64: 128, 256>}]} {
    %c128_i32 = arith.constant 128 : i32
    %0 = arith.muli %arg0, %c128_i32 : i32
    %1 = tpu.assume_multiple %0, 8 : i32
    %2 = arith.index_cast %1 : i32 to index
    %c0 = arith.constant 0 : index
    %3 = vector.load %arg3[%2, %c0] : memref<256x1xf32, #tpu.memory_space<vmem>>, vector<128x1xf32>
    %4 = arith.index_cast %1 : i32 to index
    %c0_0 = arith.constant 0 : index
    %5 = vector.load %arg4[%4, %c0_0] : memref<256x1xf32, #tpu.memory_space<vmem>>, vector<128x1xf32>
    %c0_1 = arith.constant 0 : index
    %c0_2 = arith.constant 0 : index
    %6 = vector.load %arg2[%c0_1, %c0_2] : memref<128x256xf32, #tpu.memory_space<vmem>>, vector<128x256xf32>
    %7 = vector.broadcast %3 : vector<128x1xf32> to vector<128x256xf32>
    %8 = arith.mulf %7, %6 : vector<128x256xf32>
    %9 = vector.broadcast %5 : vector<128x1xf32> to vector<128x256xf32>
    %10 = arith.addf %8, %9 : vector<128x256xf32>
    %c0_3 = arith.constant 0 : index
    %c0_4 = arith.constant 0 : index
    %11 = vector.load %arg5[%c0_3, %c0_4] : memref<128x256xf32, #tpu.memory_space<vmem>>, vector<128x256xf32>
    tpu.vector_store %arg5[%c0_3, %c0_4], %10 {strides = array<i32>} : memref<128x256xf32, #tpu.memory_space<vmem>>, vector<128x256xf32>,
    return
  }
  func.func @transform_0(%arg0: i32, %arg1: i32) -> (i32, i32) {
    %c0_i32 = arith.constant 0 : i32
    return %arg0, %arg1 : i32, i32
  }
  func.func @transform_1(%arg0: i32, %arg1: i32) -> (i32, i32) {
    %c0_i32 = arith.constant 0 : i32
    %c0_i32_0 = arith.constant 0 : i32
    %c0_i32_1 = arith.constant 0 : i32
    return %c0_i32, %c0_i32_0 : i32, i32
  }
  func.func @transform_2(%arg0: i32, %arg1: i32) -> (i32, i32) {
    %c0_i32 = arith.constant 0 : i32
    %c0_i32_0 = arith.constant 0 : i32
    %c0_i32_1 = arith.constant 0 : i32
    return %c0_i32, %c0_i32_0 : i32, i32
  }
  func.func @transform_3(%arg0: i32, %arg1: i32) -> (i32, i32) {
    %c0_i32 = arith.constant 0 : i32
    return %arg0, %arg1 : i32, i32
  }
}

</mosaic_0001>

<bundles_post_ra>
// kernel: affine_forward.2
= control target key start
LH: loop header
LB: loop body
LE: loop exit
PB: predicated region body
PF: predicated region fallthrough
CT: control target
= control target key end

     0   :  { %14 = vsyncpa [#allocation3], 0  ;;  %s515_s0 = inlined_call_operand.vmem [shape: f32[2,16], index: 0, kind: input, shape index: {}]   ;;  %s516_s1 = inlined_call_operand.hbm [shape: f32[16,256], index: 1, kind: input, shape index: {}]   ;;  %s517_s2 = inlined_call_operand.hbm [shape: f32[1,256], index: 2, kind: input, shape index: {}]   ;;  %s518_s3 = inlined_call_operand.hbm [shape: f32[128,128], index: 3, kind: input, shape index: {}]   ;;  %s519_s4 = inlined_call_operand.hbm [shape: f32[1,128], index: 4, kind: input, shape index: {}]   ;;  %s520_s5 = inlined_call_operand.hbm [shape: f32[128,128], index: 5, kind: input, shape index: {}]   ;;  %s521_s6 = inlined_call_operand.hbm [shape: f32[1,128], index: 6, kind: input, shape index: {}]   ;;  %s522_s7 = inlined_call_operand.vmem [shape: f32[2,128], index: 7, kind: output, shape index: {0}]   ;;  %s523_s8 = inlined_call_operand.vmem [shape: f32[2,128], index: 8, kind: output, shape index: {1}]  }
   0x1   :  { %15 = vsyncpa [#allocation5], 0 }
   0x2   :  { %16 = vsyncpa [#allocation8], 0  ;;  %s38_s29 = sshll.u32 %s517_s2, 4  ;;  %s39_s29 = int_to_ptr.hbm [resolvable:$true] %s38_s29 }
   0x3   :  { %17 = vsyncpa [#allocation11], 0  ;;  %s433_s30 = smov [#allocation4]   ;;  %s62_s12 = sshll.u32 %s519_s4, 4  ;;  %s63_s12 = int_to_ptr.hbm [resolvable:$true] %s62_s12 }
   0x4   :  { %s40_s9 = sshll.u32 %s433_s30, 4  ;;  %s434_s13 = smov [#allocation7]   ;;  %s41_s9 = int_to_ptr.vmem [resolvable:$true] %s40_s9 }
   0x5   :  { %43 = dma.hbm_to_vmem [thread:$0]  %s39_s29, 32, %s41_s9, [#allocation5]  }
   0x6   :  { %s64_s14 = sshll.u32 %s434_s13, 4  ;;  %s24_s17 = sshll.u32 %s516_s1, 4  ;;  %s65_s14 = int_to_ptr.vmem [resolvable:$true] %s64_s14  ;;  %s25_s17 = int_to_ptr.hbm [resolvable:$true] %s24_s17 }
   0x7   :  { %67 = dma.hbm_to_vmem [thread:$0]  %s63_s12, 16, %s65_s14, [#allocation8]  }
   0x8   :  { %s435_s2 = smov [#allocation2]   ;;  %s48_s21 = sshll.u32 %s518_s3, 4  ;;  %s49_s21 = int_to_ptr.hbm [resolvable:$true] %s48_s21 }
   0x9   :  { %s26_s18 = sshll.u32 %s435_s2, 4  ;;  %s436_s22 = smov 256   ;;  %s27_s18 = int_to_ptr.vmem [resolvable:$true] %s26_s18 }
   0xa   :  { %s437_s4 = smov 16   ;;  %s438_s23 = smov [#allocation6]  }
   0xb   :  { %32 = dma.hbm_to_vmem [thread:$0]  %s25_s17, 512, %s27_s18, [#allocation3], %s436_s22, %s436_s22, %s437_s4  }
   0xc   :  { %s50_s24 = sshll.u32 %s438_s23, 4  ;;  %s439_s25 = smov 128   ;;  %s51_s24 = int_to_ptr.vmem [resolvable:$true] %s50_s24 }
   0xd   :  { %s440_s26 = smov 8   ;;  %s72_s28 = sshll.u32 %s520_s5, 4  ;;  %s73_s28 = int_to_ptr.hbm [resolvable:$true] %s72_s28 }
   0xe   :  { %56 = dma.hbm_to_vmem [thread:$0]  %s49_s21, 2048, %s51_s24, [#allocation5], %s439_s25, %s439_s25, %s440_s26  }
   0xf   :  { %s441_s29 = smov [#allocation9]   ;;  %s86_s10 = sshll.u32 %s521_s6, 4  ;;  %s87_s10 = int_to_ptr.hbm [resolvable:$true] %s86_s10 }
  0x10   :  { %s74_s30 = sshll.u32 %s441_s29, 4  ;;  %s442_s11 = smov [#allocation10]   ;;  %s75_s30 = int_to_ptr.vmem [resolvable:$true] %s74_s30 }
  0x11   :  { %80 = dma.hbm_to_vmem [thread:$0]  %s73_s28, 2048, %s75_s30, [#allocation8], %s439_s25, %s439_s25, %s440_s26  }
  0x12   :  { %s88_s12 = sshll.u32 %s442_s11, 4  ;;  %s89_s12 = int_to_ptr.vmem [resolvable:$true] %s88_s12 }
  0x13   :  { %91 = dma.hbm_to_vmem [thread:$0]  %s87_s10, 16, %s89_s12, [#allocation11]  }
  0x14   :  { %425 = dma.done.wait [#allocation3], 512  }
  0x15   :  { %426 = vsyncadd [#allocation3], 4294966784 }
  0x16   :  { %427 = dma.done.wait [#allocation5], 2080  }
  0x17   :  { %428 = vsyncadd [#allocation5], 4294965216 }
  0x18   :  { %429 = dma.done.wait [#allocation8], 2064  }
  0x19   :  { %430 = vsyncadd [#allocation8], 4294965232 }
  0x1a   :  { %431 = dma.done.wait [#allocation11], 16  }
  0x1b   :  { %432 = vsyncadd [#allocation11], 4294967280  ;;  %v119_v0 = vld [vmem:[#allocation2 + $0x10] sm:$0xff]  ;;  %v120_v1 = vld [vmem:[#allocation2 + $0x18] sm:$0xff]  ;;  %vm127_vm0 = vcmask 130048  }
  0x1c   :  { %v117_v2 = vld [vmem:[#allocation2] sm:$0xff]  ;;  %145 = vmatpush.msra.mxu0 %v119_v0  ;;  %165 = vmatpush.msra.mxu1 %v120_v1  ;;  %v118_v3 = vld [vmem:[#allocation2 + $0x8] sm:$0xff]  ;;  %v187_v7 = vld [vmem:[#allocation6 + $0x70] sm:$0xff] }
  0x1d   :  { %v116_v4 = vld [vmem:[%s515_s0] sm:$0x3]  ;;  %v227_v8 = vld [vmem:[#allocation9 + $0x70] sm:$0xff]  ;;  %v186_v9 = vld [vmem:[#allocation6 + $0x68] sm:$0xff] }
  0x1e   :  { %v188_v5 = vld [vmem:[#allocation6 + $0x78] sm:$0xff]  ;;  %146 = vmatpush.msra.mxu0 %v117_v2  ;;  %166 = vmatpush.msra.mxu1 %v118_v3  ;;  %v226_v10 = vld [vmem:[#allocation9 + $0x68] sm:$0xff]  ;;  %v185_v11 = vld [vmem:[#allocation6 + $0x60] sm:$0xff] }
  0x1f   :  { %193 = vmatpush.msra.mxu2 %v188_v5  ;;  %v228_v6 = vld [vmem:[#allocation9 + $0x78] sm:$0xff]  ;;  %267 = vmatmul.msk.f32.vlgmr.msra.gmra.mxu0 %vm127_vm0, %v116_v4  ;;  %v225_v12 = vld [vmem:[#allocation9 + $0x60] sm:$0xff]  ;;  %v183_v15 = vld [vmem:[#allocation6 + $0x50] sm:$0xff] }
  0x20   :  { %268 = vmatmul.msk.f32.vlgmr.msra.gmra.mxu1 %vm127_vm0, %v116_v4  ;;  %233 = vmatpush.msra.mxu3 %v228_v6  ;;  %v184_v13 = vld [vmem:[#allocation6 + $0x58] sm:$0xff]  ;;  %v182_v17 = vld [vmem:[#allocation6 + $0x48] sm:$0xff]  ;;  %v181_v19 = vld [vmem:[#allocation6 + $0x40] sm:$0xff] }
  0x21   :  { %194 = vmatpush.msra.mxu2 %v187_v7  ;;  %v224_v14 = vld [vmem:[#allocation9 + $0x58] sm:$0xff]  ;;  %v223_v16 = vld [vmem:[#allocation9 + $0x50] sm:$0xff]  ;;  %v222_v18 = vld [vmem:[#allocation9 + $0x48] sm:$0xff] }
  0x22   :  { %234 = vmatpush.msra.mxu3 %v227_v8  ;;  %v221_v20 = vld [vmem:[#allocation9 + $0x40] sm:$0xff]  ;;  %v180_v21 = vld [vmem:[#allocation6 + $0x38] sm:$0xff]  ;;  %v179_v23 = vld [vmem:[#allocation6 + $0x30] sm:$0xff] }
  0x23   :  { %195 = vmatpush.msra.mxu2 %v186_v9  ;;  %v220_v22 = vld [vmem:[#allocation9 + $0x38] sm:$0xff]  ;;  %v219_v24 = vld [vmem:[#allocation9 + $0x30] sm:$0xff]  ;;  %v178_v25 = vld [vmem:[#allocation6 + $0x28] sm:$0xff] }
  0x24   :  { %235 = vmatpush.msra.mxu3 %v226_v10  ;;  %v218_v26 = vld [vmem:[#allocation9 + $0x28] sm:$0xff]  ;;  %v177_v27 = vld [vmem:[#allocation6 + $0x20] sm:$0xff]  ;;  %v176_v29 = vld [vmem:[#allocation6 + $0x18] sm:$0xff] }
  0x25   :  { %196 = vmatpush.msra.mxu2 %v185_v11  ;;  %v217_v28 = vld [vmem:[#allocation9 + $0x20] sm:$0xff]  ;;  %v216_v30 = vld [vmem:[#allocation9 + $0x18] sm:$0xff]  ;;  %v175_v31 = vld [vmem:[#allocation6 + $0x10] sm:$0xff] }
  0x26   :  { %236 = vmatpush.msra.mxu3 %v225_v12  ;;  %v215_v32 = vld [vmem:[#allocation9 + $0x10] sm:$0xff]  ;;  %v174_v33 = vld [vmem:[#allocation6 + $0x8] sm:$0xff]  ;;  %v173_v35 = vld [vmem:[#allocation6] sm:$0xff] }
  0x27   :  { %197 = vmatpush.msra.mxu2 %v184_v13  ;;  %v214_v34 = vld [vmem:[#allocation9 + $0x8] sm:$0xff]  ;;  %v213_v36 = vld [vmem:[#allocation9] sm:$0xff]  ;;  %v121_v37 = vld [vmem:[#allocation4] sm:$0x3] }
  0x28   :  { %237 = vmatpush.msra.mxu3 %v224_v14  ;;  %v123_v38 = vperm.slane %v121_v37, 0  ;;  %v124_v39 = vperm.slane %v121_v37, 1  ;;  %v279_v46 = vld [vmem:[#allocation7] ss:$0 sm:$0xff]  ;;  %v280_v47 = vld [vmem:[#allocation10] ss:$0 sm:$0xff] }
  0x29   :  { %198 = vmatpush.msra.mxu2 %v183_v15 }
  0x2a   :  { %238 = vmatpush.msra.mxu3 %v223_v16 }
  0x2b   :  { %199 = vmatpush.msra.mxu2 %v182_v17 }
  0x2c   :  { %239 = vmatpush.msra.mxu3 %v222_v18 }
  0x2d   :  { %200 = vmatpush.msra.mxu2 %v181_v19 }
  0x2e   :  { %240 = vmatpush.msra.mxu3 %v221_v20 }
  0x2f   :  { %201 = vmatpush.msra.mxu2 %v180_v21 }
  0x30   :  { %241 = vmatpush.msra.mxu3 %v220_v22 }
  0x31   :  { %202 = vmatpush.msra.mxu2 %v179_v23 }
  0x32   :  { %242 = vmatpush.msra.mxu3 %v219_v24 }
  0x33   :  { %203 = vmatpush.msra.mxu2 %v178_v25 }
  0x34   :  { %243 = vmatpush.msra.mxu3 %v218_v26 }
  0x35   :  { %204 = vmatpush.msra.mxu2 %v177_v27 }
  0x36   :  { %244 = vmatpush.msra.mxu3 %v217_v28 }
  0x37   :  { %205 = vmatpush.msra.mxu2 %v176_v29 }
  0x38   :  { %245 = vmatpush.msra.mxu3 %v216_v30 }
  0x39   :  { %206 = vmatpush.msra.mxu2 %v175_v31 }
  0x3a   :  { %246 = vmatpush.msra.mxu3 %v215_v32 }
  0x3b   :  { %207 = vmatpush.msra.mxu2 %v174_v33 }
  0x3c   :  { %247 = vmatpush.msra.mxu3 %v214_v34 }
  0x3d   :  { %208 = vmatpush.msra.mxu2 %v173_v35 }
  0x3e   :  { %248 = vmatpush.msra.mxu3 %v213_v36 }
  0x9c   :  { %v148_v40 = vpop.f32.mrf.mxu0 }
  0x9d   :  { %v168_v41 = vpop.f32.mrf.mxu1  ;;  %v149_v42 = vadd.f32 %v148_v40, %v123_v38 }
  0x9e   :  { %v169_v43 = vadd.f32 %v168_v41, %v124_v39 }
  0x9f   :  { %v171_v44 = vmax.f32 %v149_v42, 0.0 }
  0xa0   :  { %v172_v45 = vmax.f32 %v169_v43, 0.0 }
  0xa1   :  { %209 = vmatmul.f32.vlgmr.msra.gmra.mxu2 %v171_v44 }
  0xa2   :  { %249 = vmatmul.f32.vlgmr.msra.gmra.mxu3 %v172_v45 }
 0x124   :  { %v210_v48 = vpop.f32.mrf.mxu2 }
 0x125   :  { %v250_v49 = vpop.f32.mrf.mxu3  ;;  %v211_v50 = vadd.f32 %v279_v46, %v210_v48 }
 0x126   :  { %v251_v51 = vadd.f32 %v280_v47, %v250_v49 }
 0x127   :  { %253 = vst [vmem:[%s522_s7] sm:$0x3] %v211_v50 }
 0x128   :  { %254 = vst [vmem:[%s523_s8] sm:$0x3] %v251_v51 }
 0x129   :  { %263 = vsyncpa [#allocation3], 1 }
 0x12a   :  { %264 = vsyncpa [#allocation5], 1 }
 0x12b   :  { %265 = vsyncpa [#allocation8], 1 }
 0x12c   :  { %266 = vsyncpa [#allocation11], 1 }

// kernel: affine_forward.3
= control target key start
LH: loop header
LB: loop body
LE: loop exit
PB: predicated region body
PF: predicated region fallthrough
CT: control target
= control target key end

     0   :  { %s724_s12 = smov 0   ;;  %s726_s13 = smov 0   ;;  %s915_s0 = inlined_call_operand.vmem [shape: f32[256,256], index: 0, kind: input, shape index: {}]   ;;  %s916_s1 = inlined_call_operand.vmem [shape: f32[256,1], index: 1, kind: input, shape index: {}]   ;;  %s917_s2 = inlined_call_operand.vmem [shape: f32[256,1], index: 2, kind: input, shape index: {}]   ;;  %s918_s3 = inlined_call_operand.vmem [shape: f32[256,256], index: 3, kind: output, shape index: {}]  }
   0x1   :  { %s728_s14 = smov 0  }
   0x2 LB: > { %s25_s15 = sadd.s32 1, %s697_s13  ;;  %p639_p0 = scmp.ge.s32.totalorder %s701_s14, 1  ;;  %s701_s14 = sphi %s728_s14, %s13_s14   ;;  %s697_s13 = sphi %s726_s13, %s920_s13   ;;  %s693_s12 = sphi %s724_s12, %s919_s12  }
   0x3   : > { %p27_p1 = scmp.ge.s32.totalorder %s25_s15, 2  ;;  %p160_p2 = scmp.lt.s32.totalorder %s701_s14, 3 }
   0x5   : > { %s922_s15 = smov (%p27_p1, %s25_s15), 0  ;;  %p161_p3 = pnand %p639_p0, %p160_p2 }
   0x6   : > { %s646_s16 = sshll.u32 (!%p161_p3), %s693_s12, 7  ;;  %s640_s23 = sshll.u32 (!%p161_p3), %s693_s12, 4 }
   0x7   : > { %164 = sbr.rel (%p161_p3) target bundleno = 216 (0xd8), region = 32  ;;  %s750_s19 = scalar_lea.vmem (!%p161_p3), %s916_s1, %s646_s16 }
   0x8   : > { %s772_s22 = scalar_lea.vmem (!%p161_p3), %s917_s2, %s646_s16  ;;  %p196_p4 = scmp.lt.s32.totalorder (!%p161_p3), %s640_s23, 31 }
   0xc   : > { %v703_v0 = vmov 0   ;;  %v224_v1 = vld [vmem:[%s750_s19 + $0x20] sm:$0xff]  ;;  %v222_v2 = vld [vmem:[%s750_s19 + $0x10] sm:$0xff]  ;;  %v225_v4 = vld [vmem:[%s750_s19 + $0x28] sm:$0xff]  ;;  %s924_s23 = smov (!%p196_p4, %s640_s23), 31 }
   0xd   : > { %678 = vset.pattern.permute.xlu2 %v703_v0  ;;  %677 = vset.pattern.permute.xlu1 %v703_v0  ;;  %v220_v3 = vld [vmem:[%s750_s19] sm:$0xff]  ;;  %v223_v5 = vld [vmem:[%s750_s19 + $0x18] sm:$0xff]  ;;  %v221_v6 = vld [vmem:[%s750_s19 + $0x8] sm:$0xff]  ;;  %s649_s24 = sshll.u32 %s924_s23, 4 }
   0xe   : > { %676 = vset.pattern.permute.xlu0 %v703_v0  ;;  %307 = vperm.xlu2 %678, %v224_v1   ;;  %v228_v7 = vld [vmem:[%s750_s19 + $0x40] sm:$0xff]  ;;  %v227_v8 = vld [vmem:[%s750_s19 + $0x38] sm:$0xff]  ;;  %v226_v9 = vld [vmem:[%s750_s19 + $0x30] sm:$0xff]  ;;  %s807_s27 = scalar_lea.vmem %s915_s0, %s649_s24  ;;  %s814_s30 = scalar_lea.vmem %s918_s3, %s649_s24 }
   0xf   : > { %297 = vperm.xlu1 %677, %v222_v2   ;;  %287 = vperm.xlu0 %676, %v220_v3   ;;  %v231_v10 = vld [vmem:[%s750_s19 + $0x58] sm:$0xff]  ;;  %v230_v11 = vld [vmem:[%s750_s19 + $0x50] sm:$0xff]  ;;  %v229_v12 = vld [vmem:[%s750_s19 + $0x48] sm:$0xff] }
  0x10   : > { %v234_v13 = vld [vmem:[%s750_s19 + $0x70] sm:$0xff]  ;;  %v233_v14 = vld [vmem:[%s750_s19 + $0x68] sm:$0xff]  ;;  %v232_v15 = vld [vmem:[%s750_s19 + $0x60] sm:$0xff] }
  0x11   : > { %v238_v16 = vld [vmem:[%s772_s22 + $0x8] sm:$0xff]  ;;  %v237_v17 = vld [vmem:[%s772_s22] sm:$0xff]  ;;  %v235_v18 = vld [vmem:[%s750_s19 + $0x78] sm:$0xff] }
  0x12   : > { %v241_v19 = vld [vmem:[%s772_s22 + $0x20] sm:$0xff]  ;;  %v240_v20 = vld [vmem:[%s772_s22 + $0x18] sm:$0xff]  ;;  %v239_v21 = vld [vmem:[%s772_s22 + $0x10] sm:$0xff] }
  0x13   : > { %v244_v22 = vld [vmem:[%s772_s22 + $0x38] sm:$0xff]  ;;  %v243_v23 = vld [vmem:[%s772_s22 + $0x30] sm:$0xff]  ;;  %v242_v24 = vld [vmem:[%s772_s22 + $0x28] sm:$0xff] }
  0x14   : > { %v247_v25 = vld [vmem:[%s772_s22 + $0x50] sm:$0xff]  ;;  %v246_v26 = vld [vmem:[%s772_s22 + $0x48] sm:$0xff]  ;;  %v245_v27 = vld [vmem:[%s772_s22 + $0x40] sm:$0xff] }
  0x15   : > { %v250_v28 = vld [vmem:[%s772_s22 + $0x68] sm:$0xff]  ;;  %v249_v29 = vld [vmem:[%s772_s22 + $0x60] sm:$0xff]  ;;  %v248_v30 = vld [vmem:[%s772_s22 + $0x58] sm:$0xff] }
  0x16   : > { %312 = vperm.xlu2 %678, %v225_v4   ;;  %v252_v31 = vld [vmem:[%s772_s22 + $0x78] sm:$0xff]  ;;  %v251_v32 = vld [vmem:[%s772_s22 + $0x70] sm:$0xff]  ;;  %v261_v51 = vld [vmem:[%s807_s27 + $0x40] sm:$0xff] }
  0x17   : > { %302 = vperm.xlu1 %677, %v223_v5   ;;  %292 = vperm.xlu0 %676, %v221_v6   ;;  %v255_v42 = vld [vmem:[%s807_s27 + $0x10] sm:$0xff]  ;;  %v256_v43 = vld [vmem:[%s807_s27 + $0x18] sm:$0xff]  ;;  %v262_v52 = vld [vmem:[%s807_s27 + $0x48] sm:$0xff] }
  0x18   : > { %v267_v60 = vld [vmem:[%s807_s27 + $0x70] sm:$0xff]  ;;  %v268_v61 = vld [vmem:[%s807_s27 + $0x78] sm:$0xff]  ;;  %v253_v5 = vld [vmem:[%s807_s27] sm:$0xff] }
  0x19   : > { %v273_v6 = vld [vmem:[%s807_s27 + $0xa0] sm:$0xff] }
  0x1e   : > { %327 = vperm.xlu2 %678, %v228_v7   ;;  %v274_v7 = vld [vmem:[%s807_s27 + $0xa8] sm:$0xff] }
  0x1f   : > { %322 = vperm.xlu1 %677, %v227_v8   ;;  %317 = vperm.xlu0 %676, %v226_v9   ;;  %v254_v8 = vld [vmem:[%s807_s27 + $0x8] sm:$0xff] }
  0x26   : > { %342 = vperm.xlu2 %678, %v231_v10  }
  0x27   : > { %337 = vperm.xlu1 %677, %v230_v11   ;;  %332 = vperm.xlu0 %676, %v229_v12  }
  0x2e   : > { %357 = vperm.xlu2 %678, %v234_v13  }
  0x2f   : > { %352 = vperm.xlu1 %677, %v233_v14   ;;  %347 = vperm.xlu0 %676, %v232_v15  }
  0x36   : > { %404 = vperm.xlu2 %678, %v238_v16  }
  0x37   : > { %399 = vperm.xlu1 %677, %v237_v17   ;;  %362 = vperm.xlu0 %676, %v235_v18  }
  0x3e   : > { %419 = vperm.xlu2 %678, %v241_v19  }
  0x3f   : > { %414 = vperm.xlu1 %677, %v240_v20   ;;  %409 = vperm.xlu0 %676, %v239_v21   ;;  %v259_v20 = vld [vmem:[%s807_s27 + $0x30] sm:$0xff] }
  0x40   : > { %v279_v21 = vld [vmem:[%s807_s27 + $0xd0] sm:$0xff] }
  0x46   : > { %434 = vperm.xlu2 %678, %v244_v22   ;;  %v280_v22 = vld [vmem:[%s807_s27 + $0xd8] sm:$0xff] }
  0x47   : > { %429 = vperm.xlu1 %677, %v243_v23   ;;  %424 = vperm.xlu0 %676, %v242_v24   ;;  %v260_v23 = vld [vmem:[%s807_s27 + $0x38] sm:$0xff]  ;;  %v257_v24 = vld [vmem:[%s807_s27 + $0x20] sm:$0xff] }
  0x4e   : > { %449 = vperm.xlu2 %678, %v247_v25   ;;  %v258_v25 = vld [vmem:[%s807_s27 + $0x28] sm:$0xff] }
  0x4f   : > { %444 = vperm.xlu1 %677, %v246_v26   ;;  %439 = vperm.xlu0 %676, %v245_v27  }
  0x56   : > { %464 = vperm.xlu2 %678, %v250_v28  }
  0x57   : > { %459 = vperm.xlu1 %677, %v249_v29   ;;  %454 = vperm.xlu0 %676, %v248_v30  }
  0x5f   : > { %474 = vperm.xlu1 %677, %v252_v31   ;;  %469 = vperm.xlu0 %676, %v251_v32  }
  0x68   : > { %v308_v33 = vpop.permute.xlu2 %307 }
  0x69   : > { %v373_v53 = vmul.f32 %v308_v33, %v261_v51  ;;  %v374_v54 = vmul.f32 %v308_v33, %v262_v52 }
  0x70   : > { %v791_v34 = vpop.permute.xlu2 %312 }
  0x78   : > { %v793_v35 = vpop.permute.xlu2 %327 }
  0x80   : > { %v796_v36 = vpop.permute.xlu2 %342 }
  0x81   : > { %v798_v37 = vpop.permute.xlu1 %297  ;;  %v288_v38 = vpop.permute.xlu0 %287 }
  0x82   : > { %v365_v9 = vmul.f32 %v288_v38, %v253_v5  ;;  %v366_v12 = vmul.f32 %v288_v38, %v254_v8  ;;  %v369_v32 = vmul.f32 %v798_v37, %v257_v24  ;;  %v284_v24 = vld [vmem:[%s807_s27 + $0xf8] sm:$0xff] }
  0x88   : > { %v800_v39 = vpop.permute.xlu2 %357 }
  0x89   : > { %v802_v40 = vpop.permute.xlu1 %302  ;;  %v293_v41 = vpop.permute.xlu0 %292 }
  0x8a   : > { %v367_v44 = vmul.f32 %v293_v41, %v255_v42  ;;  %v368_v45 = vmul.f32 %v293_v41, %v256_v43  ;;  %v371_v26 = vmul.f32 %v802_v40, %v259_v20  ;;  %v372_v29 = vmul.f32 %v802_v40, %v260_v23  ;;  %v265_v40 = vld [vmem:[%s807_s27 + $0x60] sm:$0xff]  ;;  %v283_v23 = vld [vmem:[%s807_s27 + $0xf0] sm:$0xff] }
  0x8b   : > { %v370_v43 = vmul.f32 %v798_v37, %v258_v25  ;;  %v281_v25 = vld [vmem:[%s807_s27 + $0xe0] sm:$0xff] }
  0x90   : > { %v405_v46 = vpop.permute.xlu2 %404 }
  0x91   : > { %v323_v47 = vpop.permute.xlu1 %322  ;;  %v479_v48 = vadd.f32 %v405_v46, %v367_v44  ;;  %v480_v49 = vadd.f32 %v405_v46, %v368_v45  ;;  %v816_v50 = vpop.permute.xlu0 %317  ;;  %v266_v46 = vld [vmem:[%s807_s27 + $0x68] sm:$0xff] }
  0x92   : > { %v379_v62 = vmul.f32 %v323_v47, %v267_v60  ;;  %v380_v63 = vmul.f32 %v323_v47, %v268_v61  ;;  %v377_v51 = vmul.f32 %v816_v50, %v265_v40  ;;  %v378_v37 = vmul.f32 %v816_v50, %v266_v46  ;;  %v271_v61 = vld [vmem:[%s807_s27 + $0x90] sm:$0xff]  ;;  %v269_v50 = vld [vmem:[%s807_s27 + $0x80] sm:$0xff] }
  0x93   : > { %511 = vst [vmem:[%s814_s30 + $0x10] sm:$0xff] %v479_v48  ;;  %v263_v48 = vld [vmem:[%s807_s27 + $0x50] sm:$0xff] }
  0x94   : > { %512 = vst [vmem:[%s814_s30 + $0x18] sm:$0xff] %v480_v49  ;;  %v264_v49 = vld [vmem:[%s807_s27 + $0x58] sm:$0xff]  ;;  %v375_v52 = vmul.f32 %v791_v34, %v263_v48 }
  0x98   : > { %v420_v55 = vpop.permute.xlu2 %419 }
  0x99   : > { %v338_v56 = vpop.permute.xlu1 %337  ;;  %v485_v57 = vadd.f32 %v420_v55, %v373_v53  ;;  %v486_v58 = vadd.f32 %v420_v55, %v374_v54  ;;  %v822_v59 = vpop.permute.xlu0 %332  ;;  %v376_v53 = vmul.f32 %v791_v34, %v264_v49 }
  0x9a   : > { %v385_v10 = vmul.f32 %v338_v56, %v273_v6  ;;  %v386_v11 = vmul.f32 %v338_v56, %v274_v7  ;;  %v383_v34 = vmul.f32 %v822_v59, %v271_v61 }
  0x9b   : > { %517 = vst [vmem:[%s814_s30 + $0x40] sm:$0xff] %v485_v57 }
  0x9c   : > { %518 = vst [vmem:[%s814_s30 + $0x48] sm:$0xff] %v486_v58 }
  0xa0   : > { %v435_v0 = vpop.permute.xlu2 %434 }
  0xa1   : > { %v353_v1 = vpop.permute.xlu1 %352  ;;  %v491_v2 = vadd.f32 %v435_v0, %v379_v62  ;;  %v492_v3 = vadd.f32 %v435_v0, %v380_v63  ;;  %v828_v4 = vpop.permute.xlu0 %347  ;;  %v272_v62 = vld [vmem:[%s807_s27 + $0x98] sm:$0xff]  ;;  %v270_v63 = vld [vmem:[%s807_s27 + $0x88] sm:$0xff] }
  0xa2   : > { %v391_v27 = vmul.f32 %v353_v1, %v279_v21  ;;  %v392_v28 = vmul.f32 %v353_v1, %v280_v22  ;;  %v384_v0 = vmul.f32 %v822_v59, %v272_v62  ;;  %v381_v1 = vmul.f32 %v793_v35, %v269_v50  ;;  %v276_v59 = vld [vmem:[%s807_s27 + $0xb8] sm:$0xff] }
  0xa3   : > { %523 = vst [vmem:[%s814_s30 + $0x70] sm:$0xff] %v491_v2  ;;  %v382_v2 = vmul.f32 %v793_v35, %v270_v63 }
  0xa4   : > { %524 = vst [vmem:[%s814_s30 + $0x78] sm:$0xff] %v492_v3 }
  0xa8   : > { %v450_v13 = vpop.permute.xlu2 %449 }
  0xa9   : > { %v400_v14 = vpop.permute.xlu1 %399  ;;  %v497_v15 = vadd.f32 %v450_v13, %v385_v10  ;;  %v498_v16 = vadd.f32 %v450_v13, %v386_v11  ;;  %v836_v18 = vpop.permute.xlu0 %362  ;;  %v277_v10 = vld [vmem:[%s807_s27 + $0xc0] sm:$0xff]  ;;  %v278_v11 = vld [vmem:[%s807_s27 + $0xc8] sm:$0xff] }
  0xaa   : > { %v477_v17 = vadd.f32 %v400_v14, %v365_v9  ;;  %v478_v19 = vadd.f32 %v400_v14, %v366_v12  ;;  %v275_v12 = vld [vmem:[%s807_s27 + $0xb0] sm:$0xff]  ;;  %v389_v35 = vmul.f32 %v828_v4, %v277_v10  ;;  %v390_v13 = vmul.f32 %v828_v4, %v278_v11  ;;  %v282_v4 = vld [vmem:[%s807_s27 + $0xe8] sm:$0xff] }
  0xab   : > { %529 = vst [vmem:[%s814_s30 + $0xa0] sm:$0xff] %v497_v15  ;;  %v387_v14 = vmul.f32 %v796_v36, %v275_v12  ;;  %v388_v15 = vmul.f32 %v796_v36, %v276_v59  ;;  %v395_v36 = vmul.f32 %v836_v18, %v283_v23 }
  0xac   : > { %530 = vst [vmem:[%s814_s30 + $0xa8] sm:$0xff] %v498_v16 }
  0xad   : > { %509 = vst [vmem:[%s814_s30] sm:$0xff] %v477_v17 }
  0xae   : > { %510 = vst [vmem:[%s814_s30 + $0x8] sm:$0xff] %v478_v19 }
  0xb0   : > { %v465_v30 = vpop.permute.xlu2 %464 }
  0xb1   : > { %v415_v31 = vpop.permute.xlu1 %414  ;;  %v503_v33 = vadd.f32 %v465_v30, %v391_v27  ;;  %v504_v38 = vadd.f32 %v465_v30, %v392_v28  ;;  %v410_v42 = vpop.permute.xlu0 %409  ;;  %v393_v27 = vmul.f32 %v800_v39, %v281_v25  ;;  %v394_v28 = vmul.f32 %v800_v39, %v282_v4 }
  0xb2   : > { %v483_v41 = vadd.f32 %v415_v31, %v371_v26  ;;  %v484_v44 = vadd.f32 %v415_v31, %v372_v29  ;;  %v481_v45 = vadd.f32 %v410_v42, %v369_v32  ;;  %v482_v47 = vadd.f32 %v410_v42, %v370_v43 }
  0xb3   : > { %535 = vst [vmem:[%s814_s30 + $0xd0] sm:$0xff] %v503_v33  ;;  %v396_v26 = vmul.f32 %v836_v18, %v284_v24 }
  0xb4   : > { %536 = vst [vmem:[%s814_s30 + $0xd8] sm:$0xff] %v504_v38 }
  0xb5   : > { %515 = vst [vmem:[%s814_s30 + $0x30] sm:$0xff] %v483_v41 }
  0xb6   : > { %516 = vst [vmem:[%s814_s30 + $0x38] sm:$0xff] %v484_v44 }
  0xb7   : > { %513 = vst [vmem:[%s814_s30 + $0x20] sm:$0xff] %v481_v45 }
  0xb8   : > { %514 = vst [vmem:[%s814_s30 + $0x28] sm:$0xff] %v482_v47 }
  0xb9   : > { %v430_v54 = vpop.permute.xlu1 %429  ;;  %v425_v57 = vpop.permute.xlu0 %424 }
  0xba   : > { %v489_v55 = vadd.f32 %v430_v54, %v377_v51  ;;  %v490_v56 = vadd.f32 %v430_v54, %v378_v37  ;;  %v487_v58 = vadd.f32 %v425_v57, %v375_v52  ;;  %v488_v60 = vadd.f32 %v425_v57, %v376_v53 }
  0xbc   : > { %521 = vst [vmem:[%s814_s30 + $0x60] sm:$0xff] %v489_v55 }
  0xbd   : > { %522 = vst [vmem:[%s814_s30 + $0x68] sm:$0xff] %v490_v56 }
  0xbe   : > { %519 = vst [vmem:[%s814_s30 + $0x50] sm:$0xff] %v487_v58 }
  0xbf   : > { %520 = vst [vmem:[%s814_s30 + $0x58] sm:$0xff] %v488_v60 }
  0xc1   : > { %v445_v3 = vpop.permute.xlu1 %444  ;;  %v440_v7 = vpop.permute.xlu0 %439 }
  0xc2   : > { %v495_v5 = vadd.f32 %v445_v3, %v383_v34  ;;  %v496_v6 = vadd.f32 %v445_v3, %v384_v0  ;;  %v493_v8 = vadd.f32 %v440_v7, %v381_v1  ;;  %v494_v9 = vadd.f32 %v440_v7, %v382_v2 }
  0xc4   : > { %527 = vst [vmem:[%s814_s30 + $0x90] sm:$0xff] %v495_v5 }
  0xc5   : > { %528 = vst [vmem:[%s814_s30 + $0x98] sm:$0xff] %v496_v6 }
  0xc6   : > { %525 = vst [vmem:[%s814_s30 + $0x80] sm:$0xff] %v493_v8 }
  0xc7   : > { %526 = vst [vmem:[%s814_s30 + $0x88] sm:$0xff] %v494_v9 }
  0xc9   : > { %v460_v16 = vpop.permute.xlu1 %459  ;;  %v455_v20 = vpop.permute.xlu0 %454 }
  0xca   : > { %v501_v17 = vadd.f32 %v460_v16, %v389_v35  ;;  %v502_v19 = vadd.f32 %v460_v16, %v390_v13  ;;  %v499_v21 = vadd.f32 %v455_v20, %v387_v14  ;;  %v500_v22 = vadd.f32 %v455_v20, %v388_v15 }
  0xcc   : > { %533 = vst [vmem:[%s814_s30 + $0xc0] sm:$0xff] %v501_v17 }
  0xcd   : > { %534 = vst [vmem:[%s814_s30 + $0xc8] sm:$0xff] %v502_v19 }
  0xce   : > { %531 = vst [vmem:[%s814_s30 + $0xb0] sm:$0xff] %v499_v21 }
  0xcf   : > { %532 = vst [vmem:[%s814_s30 + $0xb8] sm:$0xff] %v500_v22 }
  0xd1   : > { %v475_v29 = vpop.permute.xlu1 %474  ;;  %v470_v32 = vpop.permute.xlu0 %469 }
  0xd2   : > { %v507_v30 = vadd.f32 %v475_v29, %v395_v36  ;;  %v508_v31 = vadd.f32 %v475_v29, %v396_v26  ;;  %v505_v33 = vadd.f32 %v470_v32, %v393_v27  ;;  %v506_v38 = vadd.f32 %v470_v32, %v394_v28 }
  0xd4   : > { %539 = vst [vmem:[%s814_s30 + $0xf0] sm:$0xff] %v507_v30 }
  0xd5   : > { %540 = vst [vmem:[%s814_s30 + $0xf8] sm:$0xff] %v508_v31 }
  0xd6   : > { %537 = vst [vmem:[%s814_s30 + $0xe0] sm:$0xff] %v505_v33 }
  0xd7   : > { %538 = vst [vmem:[%s814_s30 + $0xe8] sm:$0xff] %v506_v38 }
  0xd8 PF: > { %s13_s14 = sadd.s32 1, %s701_s14   ;;  %s919_s12 = smov %s697_s13 }
  0xd9   : > { %p10_p5 = scmp.ge.s32.totalorder %s13_s14, 4   ;;  %s920_s13 = smov %s922_s15 }
  0xdb   :  { %12 = sbr.rel (!%p10_p5) target bundleno = 2 (0x2), region = 64 }

</bundles_post_ra>
